<compile_context>
chip_gen: v7x
topology: tpu7x:2x2x1
jax: 0.10.0
libtpu: 0.0.40
codegen_flags: <defaults>
</compile_context>

<pallas_src>
import functools

import jax
import jax.numpy as jnp
from jax.experimental import pallas as pl
from jax.experimental.pallas import tpu as pltpu

NEG_SLOPE = 0.01  # torch.nn.functional.leaky_relu default


def _round_up(x, m):
    return (x + m - 1) // m * m


def affine_kernel(h_ref, w1_ref, b1_ref, w2_ref, o_ref, *, compute_dtype):
    # Cast the streamed rows to the MXU compute dtype in-kernel (VPU) instead
    # of materializing a padded/cast copy of h in HBM.
    h = h_ref[...].astype(compute_dtype)
    # First linear (MLP): (TM, D_in) @ (D_in, D_mlp_p), f32 accumulation on MXU.
    x = jnp.dot(h, w1_ref[...], preferred_element_type=jnp.float32)
    x = x + b1_ref[...]                   # bias in f32
    x = jnp.maximum(x, NEG_SLOPE * x)     # LeakyReLU: one mul + one max on VPU
    # TODO(synk): dropout omitted (inference-mode identity; a training path
    # would need pltpu.prng_seed / prng_random_bits based masking).
    # Second linear (affine, bias-free): (TM, D_mlp_p) @ (D_mlp_p, D_lab_p).
    y = jnp.dot(x.astype(compute_dtype), w2_ref[...],
                preferred_element_type=jnp.float32)
    o_ref[...] = y.astype(o_ref.dtype)


def _vmem_estimate(tm, d_in, d_mlp_p, d_lab_p, in_bytes, cd_bytes, out_bytes):
    return (
        2 * tm * d_in * in_bytes                                   # streamed h tile (dbuf)
        + 2 * tm * d_lab_p * out_bytes                             # output tile (dbuf)
        + 2 * (d_in * d_mlp_p + d_mlp_p * d_lab_p) * cd_bytes      # resident weights (dbuf)
        + 2 * d_mlp_p * 4                                          # bias
        + tm * d_in * cd_bytes                                     # in-kernel bf16 copy of h
        + tm * d_mlp_p * (4 + cd_bytes)                            # f32 intermediate + bf16 cast
    )


def _vmem_capacity_bytes():
    try:
        return int(pltpu.get_tpu_info().vmem_capacity_bytes)
    except Exception:
        return 64 << 20  # conservative fallback: v7x (64 MiB per TensorCore)


def prepare_affine_params(w1_t, b1, w2_t, *, compute_dtype=jnp.bfloat16):
    """Pad + cast the (transposed) Linear weights ONCE, at model-load time.

    w1_t: (D_in, D_mlp)   transposed torch weight of the MLP Linear
    b1:   (D_mlp,) or (1, D_mlp)
    w2_t: (D_mlp, D_lab)  transposed torch weight of the bias-free affine
    Only the output feature dims are padded (to multiples of 128); zero
    padding keeps padded lanes exactly zero through LeakyReLU and matmul 2.
    """
    d_in, d_mlp = w1_t.shape
    d_mlp2, d_lab = w2_t.shape
    assert d_mlp2 == d_mlp, "w1_t / w2_t inner dims must match"
    if b1.ndim == 1:
        b1 = b1[None, :]
    assert b1.shape == (1, d_mlp), "b1 must have shape (D_mlp,) or (1, D_mlp)"

    d_mlp_p = _round_up(d_mlp, 128)
    d_lab_p = _round_up(d_lab, 128)

    w1_p = jnp.pad(w1_t, ((0, 0), (0, d_mlp_p - d_mlp))).astype(compute_dtype)
    b1_p = jnp.pad(b1, ((0, 0), (0, d_mlp_p - d_mlp))).astype(jnp.float32)
    w2_p = jnp.pad(w2_t, ((0, d_mlp_p - d_mlp), (0, d_lab_p - d_lab))).astype(compute_dtype)
    return (w1_p, b1_p, w2_p), d_lab


@functools.partial(jax.jit, static_argnames=("d_lab", "tm"))
def affine_forward(h, w1_p, b1_p, w2_p, *, d_lab, tm=1024):
    """h: (N, D_in) f32. (w1_p, b1_p, w2_p) from prepare_affine_params. -> (N, d_lab)."""
    n, d_in = h.shape
    d_mlp_p = w1_p.shape[1]
    d_lab_p = w2_p.shape[1]
    compute_dtype = w1_p.dtype
    in_bytes = jnp.dtype(h.dtype).itemsize
    cd_bytes = jnp.dtype(compute_dtype).itemsize
    out_dtype = h.dtype  # keep f32 output; switch to bf16 here if consumers tolerate it
    out_bytes = jnp.dtype(out_dtype).itemsize

    # ---- generation-aware VMEM budget (trace-time hardware query) ----
    vmem_cap = _vmem_capacity_bytes()
    if vmem_cap >= (100 << 20):          # v5e / v6e: 128 MiB VMEM per core
        vmem_budget, vmem_cap_limit = 56 << 20, 100 << 20
    else:                                # v7x: 64 MiB VMEM per TensorCore
        vmem_budget, vmem_cap_limit = 24 << 20, 48 << 20

    # ---- row-tile selection ----
    row_align = 16 if cd_bytes < 4 else 8   # bf16 packs two rows per sublane
    tm = max(1, min(tm, n))
    if tm != n:
        tm = min(_round_up(tm, row_align), n)
    # Shrink to the VMEM budget; floor at 128 rows (below that the weights, not
    # the row tile, dominate VMEM and tiny tiles are pure per-step overhead).
    while tm > 128 and _vmem_estimate(tm, d_in, d_mlp_p, d_lab_p,
                                      in_bytes, cd_bytes, out_bytes) > vmem_budget:
        tm = max(128, _round_up(tm // 2, row_align))
    # v7x has 2 TensorCores: make sure the "parallel" row axis has >= 2 tiles
    # when there is enough work (negligible extra loop overhead on 1-TC parts).
    if n >= 256 and pl.cdiv(n, tm) < 2:
        tm = min(_round_up(pl.cdiv(n, 2), row_align), n)

    est = _vmem_estimate(tm, d_in, d_mlp_p, d_lab_p, in_bytes, cd_bytes, out_bytes)
    # The estimate already includes double-buffering; add a fixed margin rather
    # than 2x, and never request the whole physical VMEM.
    vmem_limit = int(min(max(est + (8 << 20), 16 << 20), vmem_cap_limit))

    cost = pl.CostEstimate(
        flops=2 * n * (d_in * d_mlp_p + d_mlp_p * d_lab_p),
        transcendentals=0,
        bytes_accessed=int(
            n * d_in * in_bytes
            + (d_in * d_mlp_p + d_mlp_p * d_lab_p) * cd_bytes
            + d_mlp_p * 4
            + n * d_lab_p * out_bytes),
    )

    out_p = pl.pallas_call(
        functools.partial(affine_kernel, compute_dtype=compute_dtype),
        out_shape=jax.ShapeDtypeStruct((n, d_lab_p), out_dtype),
        grid_spec=pltpu.PrefetchScalarGridSpec(
            num_scalar_prefetch=0,
            grid=(pl.cdiv(n, tm),),
            in_specs=[
                pl.BlockSpec((tm, d_in), lambda i: (i, 0)),          # streamed rows (f32)
                pl.BlockSpec((d_in, d_mlp_p), lambda i: (0, 0)),     # resident weight 1
                pl.BlockSpec((1, d_mlp_p), lambda i: (0, 0)),        # resident bias
                pl.BlockSpec((d_mlp_p, d_lab_p), lambda i: (0, 0)),  # resident weight 2
            ],
            out_specs=pl.BlockSpec((tm, d_lab_p), lambda i: (i, 0)),
        ),
        compiler_params=pltpu.CompilerParams(
            dimension_semantics=("parallel",),   # independent row tiles -> megacore
            vmem_limit_bytes=vmem_limit,
        ),
        cost_estimate=cost,
    )(h, w1_p, b1_p, w2_p)

    return out_p[:, :d_lab] if d_lab != d_lab_p else out_p


def reference_forward(h, w1_t, b1, w2_t):
    x = h @ w1_t + b1.reshape(1, -1)
    x = jnp.where(x > 0, x, NEG_SLOPE * x)
    return x @ w2_t


if __name__ == "__main__":
    key = jax.random.PRNGKey(0)

    def run_case(n, d_in, d_mlp, d_lab, case_key):
        k_h, k_w1, k_b1, k_w2 = jax.random.split(case_key, 4)
        h = jax.random.normal(k_h, (n, d_in), dtype=jnp.float32)
        # PyTorch nn.Linear weight is (out, in); the kernel takes transposed (in, out).
        w1_t = jax.random.normal(k_w1, (d_in, d_mlp), dtype=jnp.float32) * 0.1
        b1 = jax.random.normal(k_b1, (d_mlp,), dtype=jnp.float32) * 0.1
        w2_t = jax.random.normal(k_w2, (d_mlp, d_lab), dtype=jnp.float32) * 0.1

        params, d_lab_out = prepare_affine_params(w1_t, b1, w2_t)  # once, at "load"
        y = affine_forward(h, *params, d_lab=d_lab_out)
        jax.block_until_ready(y)

        y_ref = reference_forward(h, w1_t, b1, w2_t)
        assert y.shape == (n, d_lab)
        # bf16 MXU inputs with f32 accumulation -> relaxed tolerance vs f32 reference.
        assert jnp.allclose(y, y_ref, atol=5e-2, rtol=5e-2), \
            f"mismatch vs reference for case {(n, d_in, d_mlp, d_lab)}"

    k1, k2 = jax.random.split(key)
    # Small shapes consistent with Affine(input_dim, labels_dim, mlp_dim, mlp_dropout).
    run_case(8, 32, 64, 16, k1)
    # Non-aligned, multi-tile case: exercises feature padding, partial last row
    # tile and the >=2-tiles megacore split.
    run_case(300, 200, 300, 40, k2)

    print("KERNEL_OK")
</pallas_src>

<mosaic_0001>
module attributes {stable_mosaic.version = 11 : i64} {
  func.func @affine_kernel(%arg0: i32, %arg1: memref<8x32xf32, #tpu.memory_space<vmem>>, %arg2: memref<32x128xbf16, #tpu.memory_space<vmem>>, %arg3: memref<1x128xf32, #tpu.memory_space<vmem>>, %arg4: memref<128x128xbf16, #tpu.memory_space<vmem>>, %arg5: memref<8x128xf32, #tpu.memory_space<vmem>>) attributes {dimension_semantics = [#tpu.dimension_semantics<parallel>], iteration_bounds = array<i64: 1>, scalar_prefetch = 0 : i64, scratch_operands = 0 : i64, tpu.core_type = #tpu.core_type<tc>, window_params = [{transform_indices = @transform_0, window_bounds = array<i64: 8, 32>}, {pipeline_mode = #tpu.pipeline_mode<synchronous>, transform_indices = @transform_1, window_bounds = array<i64: 32, 128>}, {pipeline_mode = #tpu.pipeline_mode<synchronous>, transform_indices = @transform_2, window_bounds = array<i64: 1, 128>}, {pipeline_mode = #tpu.pipeline_mode<synchronous>, transform_indices = @transform_3, window_bounds = array<i64: 128, 128>}, {transform_indices = @transform_4, window_bounds = array<i64: 8, 128>}]} {
    %c0 = arith.constant 0 : index
    %c0_0 = arith.constant 0 : index
    %0 = vector.load %arg1[%c0, %c0_0] : memref<8x32xf32, #tpu.memory_space<vmem>>, vector<8x32xf32>
    %1 = arith.truncf %0 : vector<8x32xf32> to vector<8x32xbf16>
    %c0_1 = arith.constant 0 : index
    %c0_2 = arith.constant 0 : index
    %2 = vector.load %arg2[%c0_1, %c0_2] : memref<32x128xbf16, #tpu.memory_space<vmem>>, vector<32x128xbf16>
    %cst = arith.constant dense<0.000000e+00> : vector<8x128xf32>
    %3 = tpu.matmul %1, %2, %cst {dimension_numbers = #tpu.dot_dimension_numbers<[1], [0], [0], [1], [0, 0, 1, 1], [], []>} : vector<8x32xbf16>, vector<32x128xbf16>, vector<8x128xf32> -> vector<8x128xf32>
    %c0_3 = arith.constant 0 : index
    %c0_4 = arith.constant 0 : index
    %4 = vector.load %arg3[%c0_3, %c0_4] : memref<1x128xf32, #tpu.memory_space<vmem>>, vector<1x128xf32>
    %5 = vector.broadcast %4 : vector<1x128xf32> to vector<8x128xf32>
    %6 = arith.addf %3, %5 : vector<8x128xf32>
    %cst_5 = arith.constant 0.00999999977 : f32
    %7 = vector.broadcast %cst_5 : f32 to vector<8x128xf32>
    %8 = arith.mulf %7, %6 : vector<8x128xf32>
    %9 = arith.maximumf %6, %8 : vector<8x128xf32>
    %10 = arith.truncf %9 : vector<8x128xf32> to vector<8x128xbf16>
    %c0_6 = arith.constant 0 : index
    %c0_7 = arith.constant 0 : index
    %11 = vector.load %arg4[%c0_6, %c0_7] : memref<128x128xbf16, #tpu.memory_space<vmem>>, vector<128x128xbf16>
    %cst_8 = arith.constant dense<0.000000e+00> : vector<8x128xf32>
    %12 = tpu.matmul %10, %11, %cst_8 {dimension_numbers = #tpu.dot_dimension_numbers<[1], [0], [0], [1], [0, 0, 1, 1], [], []>} : vector<8x128xbf16>, vector<128x128xbf16>, vector<8x128xf32> -> vector<8x128xf32>
    %c0_9 = arith.constant 0 : index
    %c0_10 = arith.constant 0 : index
    %13 = vector.load %arg5[%c0_9, %c0_10] : memref<8x128xf32, #tpu.memory_space<vmem>>, vector<8x128xf32>
    tpu.vector_store %arg5[%c0_9, %c0_10], %12 {strides = array<i32>} : memref<8x128xf32, #tpu.memory_space<vmem>>, vector<8x128xf32>,
    return
  }
  func.func @transform_0(%arg0: i32) -> (i32, i32) {
    %c0_i32 = arith.constant 0 : i32
    %c0_i32_0 = arith.constant 0 : i32
    return %arg0, %c0_i32 : i32, i32
  }
  func.func @transform_1(%arg0: i32) -> (i32, i32) {
    %c0_i32 = arith.constant 0 : i32
    %c0_i32_0 = arith.constant 0 : i32
    %c0_i32_1 = arith.constant 0 : i32
    return %c0_i32, %c0_i32_0 : i32, i32
  }
  func.func @transform_2(%arg0: i32) -> (i32, i32) {
    %c0_i32 = arith.constant 0 : i32
    %c0_i32_0 = arith.constant 0 : i32
    %c0_i32_1 = arith.constant 0 : i32
    return %c0_i32, %c0_i32_0 : i32, i32
  }
  func.func @transform_3(%arg0: i32) -> (i32, i32) {
    %c0_i32 = arith.constant 0 : i32
    %c0_i32_0 = arith.constant 0 : i32
    %c0_i32_1 = arith.constant 0 : i32
    return %c0_i32, %c0_i32_0 : i32, i32
  }
  func.func @transform_4(%arg0: i32) -> (i32, i32) {
    %c0_i32 = arith.constant 0 : i32
    %c0_i32_0 = arith.constant 0 : i32
    return %arg0, %c0_i32 : i32, i32
  }
}

</mosaic_0001>

<bundles_post_ra>
// kernel: affine_forward.1
= control target key start
LH: loop header
LB: loop body
LE: loop exit
PB: predicated region body
PF: predicated region fallthrough
CT: control target
= control target key end

     0   :  { %9 = vsyncpa [#allocation3], 0  ;;  %s505_s0 = inlined_call_operand.hbm [shape: f32[8,32], index: 0, kind: input, shape index: {}]   ;;  %s506_s1 = inlined_call_operand.hbm [shape: bf16[32,128], index: 1, kind: input, shape index: {}]   ;;  %s507_s2 = inlined_call_operand.vmem [shape: f32[1,128], index: 2, kind: input, shape index: {}]   ;;  %s508_s3 = inlined_call_operand.hbm [shape: bf16[128,128], index: 3, kind: input, shape index: {}]   ;;  %s509_s4 = inlined_call_operand.hbm [shape: f32[8,128], index: 4, kind: output, shape index: {}]  }
   0x1   :  { %10 = vsyncpa [#allocation6], 0 }
   0x2   :  { %11 = vsyncpa [#allocation4], 0  ;;  %s415_s15 = smov [#allocation5]   ;;  %s321_s19 = scalar_lea.hbm %s506_s1, 256 }
   0x3   :  { %s27_s16 = sshll.u32 %s415_s15, 4  ;;  %p322_p0 = scmp.ne.s32.totalorder %s506_s1, %s321_s19  ;;  %s28_s16 = int_to_ptr.vmem [resolvable:$true] %s27_s16 }
   0x4   :  { %p325_p1 = scmp.lt.u32.totalorder %s321_s19, %s506_s1 }
   0x6   :  { %p327_p2 = pnand %p325_p1, %p322_p0 }
   0x8   :  { %330 = shalt.err (!%p327_p2)
}
   0x9   :  { %s331_s24 = scalar_lea.vmem %s28_s16, 256  ;;  %p336_p4 = scmp.lt.s32.totalorder %s28_s16, %s28_s16 }
   0xa   :  { %p332_p3 = scmp.ne.s32.totalorder %s28_s16, %s331_s24  ;;  %p337_p5 = scmp.lt.s32.totalorder %s331_s24, %s331_s24 }
   0xc   :  { %p338_p6 = por %p337_p5, %p336_p4 }
   0xe   :  { %p339_p7 = pnand %p338_p6, %p332_p3 }
  0x10   :  { %342 = shalt.err (!%p339_p7)
}
  0x11   :  { %s416_s25 = smov 64   ;;  %s417_s26 = smov 4  }
  0x12   :  { %33 = dma.hbm_to_vmem [thread:$0]  %s506_s1, 256, %s28_s16, [#allocation6], %s416_s25, %s416_s25, %s417_s26  }
  0x13   :  { %s418_s29 = smov [#allocation2]   ;;  %s419_s5 = smov [#allocation7]  }
  0x14   :  { %s18_s30 = sshll.u32 %s418_s29, 4  ;;  %s41_s6 = sshll.u32 %s419_s5, 4  ;;  %s19_s30 = int_to_ptr.vmem [resolvable:$true] %s18_s30  ;;  %s42_s6 = int_to_ptr.vmem [resolvable:$true] %s41_s6 }
  0x15   :  { %s343_s9 = scalar_lea.hbm %s505_s0, 128 }
  0x16   :  { %p344_p8 = scmp.ne.s32.totalorder %s505_s0, %s343_s9  ;;  %p347_p9 = scmp.lt.u32.totalorder %s343_s9, %s505_s0 }
  0x18   :  { %p349_p10 = pnand %p347_p9, %p344_p8 }
  0x1a   :  { %352 = shalt.err (!%p349_p10)
}
  0x1b   :  { %s353_s1 = scalar_lea.vmem %s19_s30, 128  ;;  %p358_p12 = scmp.lt.s32.totalorder %s19_s30, %s19_s30 }
  0x1c   :  { %p354_p11 = scmp.ne.s32.totalorder %s19_s30, %s353_s1  ;;  %p359_p13 = scmp.lt.s32.totalorder %s353_s1, %s353_s1 }
  0x1e   :  { %p360_p0 = por %p359_p13, %p358_p12 }
  0x20   :  { %p361_p1 = pnand %p360_p0, %p354_p11 }
  0x22   :  { %364 = shalt.err (!%p361_p1)
}
  0x23   :  { %21 = dma.hbm_to_vmem [thread:$0]  %s505_s0, 128, %s19_s30, [#allocation3]  }
  0x24   :  { %s365_s18 = scalar_lea.hbm %s508_s3, 1024 }
  0x25   :  { %p366_p2 = scmp.ne.s32.totalorder %s508_s3, %s365_s18  ;;  %p369_p3 = scmp.lt.u32.totalorder %s365_s18, %s508_s3 }
  0x27   :  { %p371_p4 = pnand %p369_p3, %p366_p2 }
  0x29   :  { %374 = shalt.err (!%p371_p4)
}
  0x2a   :  { %s375_s23 = scalar_lea.vmem %s42_s6, 1024  ;;  %p380_p6 = scmp.lt.s32.totalorder %s42_s6, %s42_s6 }
  0x2b   :  { %p376_p5 = scmp.ne.s32.totalorder %s42_s6, %s375_s23  ;;  %p381_p7 = scmp.lt.s32.totalorder %s375_s23, %s375_s23 }
  0x2d   :  { %p382_p8 = por %p381_p7, %p380_p6 }
  0x2f   :  { %p383_p9 = pnand %p382_p8, %p376_p5 }
  0x31   :  { %386 = shalt.err (!%p383_p9)
}
  0x32   :  { %47 = dma.hbm_to_vmem [thread:$0]  %s508_s3, 1024, %s42_s6, [#allocation6], %s416_s25, %s416_s25, %s417_s26  }
  0x33   :  { %409 = dma.done.wait [#allocation3], 128  }
  0x34   :  { %410 = vsyncadd [#allocation3], 4294967168 }
  0x35   :  { %411 = dma.done.wait [#allocation6], 1280  }
  0x36   :  { %412 = vsyncadd [#allocation6], 4294966016  ;;  %v420_v0 = vmov 0.0   ;;  %vm421_vm0 = vmmov 0   ;;  %v311_v1 = vld [vmem:[#allocation5] sm:$0xff]   ;;  %v312_v2 = vld [vmem:[#allocation5 + $0x8] sm:$0xff]  }
  0x37   :  { %275 = vmatprep.subr.bf16.mxu0 %v420_v0  ;;  %279 = vmatprep.mubr.msk.bf16.mxu0 %vm421_vm0, %v420_v0  ;;  %v58_v3 = vld [vmem:[#allocation2] sm:$0xff]  ;;  %v313_v4 = vld [vmem:[#allocation7] sm:$0xff]   ;;  %vm83_vm1 = vcmask 261120   ;;  %v315_v7 = vld [vmem:[#allocation7 + $0x10] sm:$0xff]   ;;  %s422_s26 = smov [#allocation8]  }
  0x38   :  { %283 = vmatprep.subr.bf16.mxu1 %v420_v0  ;;  %299 = vmatprep.mubr.msk.bf16.mxu1 %vm421_vm0, %v420_v0  ;;  %v59_v5 = vpack.c.bf16 %v58_v3, %v58_v3  ;;  %v314_v6 = vld [vmem:[#allocation7 + $0x8] sm:$0xff]   ;;  %v316_v8 = vld [vmem:[#allocation7 + $0x18] sm:$0xff]   ;;  %v317_v9 = vld [vmem:[#allocation7 + $0x20] sm:$0xff]   ;;  %s241_s27 = sshll.u32 %s422_s26, 4  ;;  %s242_s27 = int_to_ptr.vmem [resolvable:$true] %s241_s27 }
  0x39   :  { %276 = vmatpush3.bf16.msra.mxu0 %v311_v1  ;;  %284 = vmatpush3.bf16.msra.mxu1 %v313_v4  ;;  %v318_v10 = vld [vmem:[#allocation7 + $0x28] sm:$0xff]   ;;  %v319_v11 = vld [vmem:[#allocation7 + $0x30] sm:$0xff]   ;;  %v320_v12 = vld [vmem:[#allocation7 + $0x38] sm:$0xff]   ;;  %s387_s28 = scalar_lea.vmem %s242_s27, 128  ;;  %p392_p11 = scmp.lt.s32.totalorder %s242_s27, %s242_s27 }
  0x3a   :  { %277 = vmatprep.subr.bf16.mxu0 %v420_v0  ;;  %285 = vmatprep.subr.bf16.mxu1 %v420_v0  ;;  %v251_v13 = vld [vmem:[%s507_s2] ss:$0 sm:$0xff]  ;;  %p388_p10 = scmp.ne.s32.totalorder %s242_s27, %s387_s28  ;;  %p393_p12 = scmp.lt.s32.totalorder %s387_s28, %s387_s28 }
  0x3c   :  { %p394_p13 = por %p393_p12, %p392_p11 }
  0x3d   :  { %278 = vmatpush3.bf16.msra.mxu0 %v312_v2  ;;  %286 = vmatpush3.bf16.msra.mxu1 %v314_v6 }
  0x3e   :  { %287 = vmatprep.subr.bf16.mxu1 %v420_v0  ;;  %p395_p0 = pnand %p394_p13, %p388_p10 }
  0x40   :  { %280 = vmatmul.mubr.msk.bf16.vlgmr.msra.gmra.mrb[0].mxu0 %vm83_vm1, %v59_v5 }
  0x41   :  { %288 = vmatpush3.bf16.msra.mxu1 %v315_v7 }
  0x42   :  { %289 = vmatprep.subr.bf16.mxu1 %v420_v0 }
  0x45   :  { %290 = vmatpush3.bf16.msra.mxu1 %v316_v8 }
  0x46   :  { %291 = vmatprep.subr.bf16.mxu1 %v420_v0 }
  0x49   :  { %292 = vmatpush3.bf16.msra.mxu1 %v317_v9 }
  0x4a   :  { %293 = vmatprep.subr.bf16.mxu1 %v420_v0 }
  0x4d   :  { %294 = vmatpush3.bf16.msra.mxu1 %v318_v10 }
  0x4e   :  { %295 = vmatprep.subr.bf16.mxu1 %v420_v0 }
  0x51   :  { %296 = vmatpush3.bf16.msra.mxu1 %v319_v11 }
  0x52   :  { %297 = vmatprep.subr.bf16.mxu1 %v420_v0 }
  0x55   :  { %298 = vmatpush3.bf16.msra.mxu1 %v320_v12 }
 0x113   :  { %v121_v14 = vpop.f32.mrb[0].mxu0 }
 0x114   :  { %v122_v15 = vadd.f32 %v251_v13, %v121_v14  ;;  %v281_v16 = vpop.f32.mrb[1].mxu0 }
 0x115   :  { %v124_v17 = vpop.f32.mrb[2].mxu0 }
 0x116   :  { %v127_v18 = vmul.f32 0.01, %v122_v15  ;;  %v282_v19 = vpop.f32.mrb[3].mxu0 }
 0x118   :  { %v128_v20 = vmax.f32 %v122_v15, %v127_v18 }
 0x11a   :  { %v129_v21 = vpack.c.bf16 %v128_v20, %v128_v20 }
 0x11c   :  { %300 = vmatmul.mubr.bf16.vlgmr.msra.gmra.mrb[0].mxu1 %v129_v21 }
 0x1ef   :  { %v228_v22 = vpop.f32.mrb[0].mxu1 }
 0x1f0   :  { %234 = vst [vmem:[#allocation8] sm:$0xff] %v228_v22  ;;  %v301_v23 = vpop.f32.mrb[1].mxu1 }
 0x1f1   :  { %v231_v24 = vpop.f32.mrb[2].mxu1 }
 0x1f2   :  { %398 = shalt.err (!%p395_p0)
}
 0x1f3   :  { %s399_s30 = scalar_lea.hbm %s509_s4, 128 }
 0x1f4   :  { %p400_p1 = scmp.ne.s32.totalorder %s509_s4, %s399_s30  ;;  %p403_p2 = scmp.lt.u32.totalorder %s399_s30, %s509_s4 }
 0x1f6   :  { %p405_p3 = pnand %p403_p2, %p400_p1 }
 0x1f8   :  { %408 = shalt.err (!%p405_p3)
}
 0x1f9   :  { %244 = dma.vmem_to_hbm [thread:$0]  %s242_s27, 128, %s509_s4, [#allocation4]   ;;  %v302_v25 = vpop.f32.mrb[3].mxu1 }
 0x1fa   :  { %413 = dma.done.wait [#allocation4], 128  }
 0x1fb   :  { %414 = vsyncadd [#allocation4], 4294967168 }
 0x1fc   :  { %248 = vsyncpa [#allocation3], 1 }
 0x1fd   :  { %249 = vsyncpa [#allocation6], 1 }
 0x1fe   :  { %250 = vsyncpa [#allocation4], 1 }

</bundles_post_ra>
